<compile_context>
chip_gen: v7x
topology: tpu7x:2x2x1
jax: 0.10.0
libtpu: 0.0.40
codegen_flags: <defaults>
</compile_context>

<pallas_src>
import math

import jax
import jax.numpy as jnp
from jax.experimental import pallas as pl
from jax.experimental.pallas import tpu as pltpu

GAMMA = 1.5
ALPHA = 0.25

_LANE_CANDIDATES = (512, 256, 128)  # lane-dense layouts (multiples of 128)


def _chip_config():
    """(per-buffer block bytes, min grid steps, auto-approx-reciprocal) per TPU gen."""
    kind = ""
    try:
        kind = jax.devices()[0].device_kind.lower()
    except Exception:
        pass
    if "v7" in kind or "7x" in kind:
        # ~3.2 TB/s per TC: 4 MiB blocks amortize the ~0.35us/step overhead to <10%;
        # keep >=2 grid steps per TensorCore so the "parallel" axis feeds both TCs;
        # approx vrcp keeps the EUP off the critical path at this bandwidth.
        return 4 << 20, 4, True
    if "v6" in kind:
        # ~1.4 TB/s: 2 MiB blocks (~12-26 MiB resident, under the 32 MiB scoped default).
        return 2 << 20, 1, False
    # v5e / unknown: ~0.8 TB/s and only 16 MiB default scoped VMEM -> 1 MiB blocks.
    return 1 << 20, 1, False


def _sublane_multiple(itemsize):
    # Packed-sublane tiling: (8,128) for 4B, (16,128) for 2B, (32,128) for 1B dtypes.
    return {4: 8, 2: 16, 1: 32}.get(int(itemsize), 8)


def _focal_math(x, y, gamma, alpha, recip):
    """Focal-loss math on f32 tensors; `recip(v)` computes 1/v."""
    # e = exp(-|x|) is shared by the stable BCE and the sigmoid
    # (EUP-class ops per element for default gamma: exp, log1p, recip, sqrt).
    e = jnp.exp(-jnp.abs(x))
    # binary_cross_entropy_with_logits, reduction='none' (stable form).
    bce = jnp.maximum(x, 0.0) - x * y + jnp.log1p(e)
    inv = recip(1.0 + e)  # 1 / (1 + exp(-|x|))
    # sigmoid(x): 1/(1+e) for x>=0, e/(1+e) for x<0 (exact form, no cancellation).
    pred_prob = jnp.where(x >= 0.0, inv, e * inv)
    p_t = y * pred_prob + (1.0 - y) * (1.0 - pred_prob)
    m = 1.0 - p_t
    g = float(gamma)
    if g == 1.5:
        mod = m * jnp.sqrt(m)            # m**1.5 without pow (saves exp+log)
    elif g == 2.0:
        mod = m * m
    elif g == 1.0:
        mod = m
    elif g == 0.0:
        mod = jnp.ones_like(m)
    else:
        mod = jnp.power(m, g)            # generic fallback
    loss = bce * mod
    a = float(alpha)
    if a > 0:
        loss = loss * (y * a + (1.0 - y) * (1.0 - a))
    return loss


def _kernel_recip(approx):
    if approx:
        return lambda v: pl.reciprocal(v, approx=True)
    return lambda v: 1.0 / v


def _make_elementwise_kernel(gamma, alpha, approx):
    recip = _kernel_recip(approx)

    def kernel(pred_ref, label_ref, out_ref):
        loss = _focal_math(pred_ref[...].astype(jnp.float32),
                           label_ref[...].astype(jnp.float32),
                           gamma, alpha, recip)
        out_ref[...] = loss.astype(out_ref.dtype)

    return kernel


def _make_sum_kernel(gamma, alpha, approx):
    recip = _kernel_recip(approx)

    def kernel(pred_ref, label_ref, out_ref, acc_ref):
        @pl.when(pl.program_id(0) == 0)
        def _():
            acc_ref[...] = jnp.zeros_like(acc_ref)

        loss = _focal_math(pred_ref[...].astype(jnp.float32),
                           label_ref[...].astype(jnp.float32),
                           gamma, alpha, recip)
        acc_ref[...] += jnp.sum(loss)

        @pl.when(pl.program_id(0) == pl.num_programs(0) - 1)
        def _():
            out_ref[...] = acc_ref[...]

    return kernel


def _tile_plan(rows, lanes, itemsizes, block_bytes, min_steps):
    """Pick tile_rows + an explicit scoped-VMEM limit for this layout."""
    # Size blocks by the f32 in-kernel working set so narrow I/O dtypes don't
    # double the live intermediates relative to the I/O block size.
    tile_rows = max(1, block_bytes // (lanes * 4))
    sub_mult = _sublane_multiple(min(itemsizes))
    tile_rows = max(sub_mult, (tile_rows // sub_mult) * sub_mult)
    if min_steps > 1:
        # Keep >= min_steps grid steps (>=2 per TC on v7x megacore) when possible.
        cap = (rows // (min_steps * sub_mult)) * sub_mult
        if cap >= sub_mult:
            tile_rows = min(tile_rows, cap)
    if tile_rows >= rows:
        tile_rows = rows  # single full-extent block (ok even if rows % sub_mult != 0)
    block_elems = tile_rows * lanes
    # 2 pipeline buffers per array + headroom for f32 intermediates, clamped so
    # we always stay under v7x's 64 MiB physical VMEM per TensorCore.
    vmem_limit = 2 * block_elems * sum(itemsizes) + 6 * block_elems * 4 + (2 << 20)
    vmem_limit = int(min(max(vmem_limit, 24 << 20), 56 << 20))
    return tile_rows, vmem_limit


def focal_loss_yolo(pred, label, gamma=GAMMA, alpha=ALPHA, *, approx_reciprocal=None):
    """Elementwise YOLO focal loss (reduction='none'); same shape/dtype as `pred`."""
    assert pred.shape == label.shape
    orig_shape = pred.shape
    out_dtype = pred.dtype
    total = math.prod(orig_shape) if orig_shape else 1

    block_bytes, min_steps, approx_auto = _chip_config()
    if approx_reciprocal is None:
        approx_reciprocal = approx_auto

    pred_flat = pred.reshape(-1)
    label_flat = label.reshape(-1)

    lanes = next((c for c in _LANE_CANDIDATES if total % c == 0), None)
    tail_out = None
    main = total
    if lanes is None:
        # Odd total: kernel on the 128-divisible prefix; the <128-element tail is
        # computed with plain jnp (avoids full-array pad + output-slice copies).
        lanes = 128
        main = (total // lanes) * lanes
        tail_loss = _focal_math(pred_flat[main:].astype(jnp.float32),
                                label_flat[main:].astype(jnp.float32),
                                gamma, alpha, lambda v: 1.0 / v).astype(out_dtype)
        if main == 0:
            return tail_loss.reshape(orig_shape)
        tail_out = tail_loss
        pred_flat = pred_flat[:main]
        label_flat = label_flat[:main]

    rows = main // lanes
    itemsizes = (jnp.dtype(pred.dtype).itemsize,
                 jnp.dtype(label.dtype).itemsize,
                 jnp.dtype(out_dtype).itemsize)
    tile_rows, vmem_limit = _tile_plan(rows, lanes, itemsizes, block_bytes, min_steps)

    grid = (pl.cdiv(rows, tile_rows),)
    spec = pl.BlockSpec((tile_rows, lanes), lambda i: (i, 0))
    n = rows * lanes
    cost = pl.CostEstimate(
        flops=16 * n,
        transcendentals=4 * n,
        bytes_accessed=n * sum(itemsizes),
    )

    out2d = pl.pallas_call(
        _make_elementwise_kernel(gamma, alpha, approx_reciprocal),
        out_shape=jax.ShapeDtypeStruct((rows, lanes), out_dtype),
        grid_spec=pltpu.PrefetchScalarGridSpec(
            num_scalar_prefetch=0,
            grid=grid,
            in_specs=[spec, spec],
            out_specs=spec,
        ),
        compiler_params=pltpu.CompilerParams(
            dimension_semantics=("parallel",),
            vmem_limit_bytes=vmem_limit,
        ),
        cost_estimate=cost,
    )(pred_flat.reshape(rows, lanes), label_flat.reshape(rows, lanes))

    if tail_out is not None:
        return jnp.concatenate([out2d.reshape(-1), tail_out]).reshape(orig_shape)
    return out2d.reshape(orig_shape)


def focal_loss_yolo_sum(pred, label, gamma=GAMMA, alpha=ALPHA, *, approx_reciprocal=None):
    """Fused-reduction variant: returns sum(focal_loss) as an f32 scalar.

    Deletes the elementwise-output HBM stream (12 -> 8 B/elem for f32 I/O) for
    consumers that immediately reduce the loss (as YOLO does).
    """
    assert pred.shape == label.shape
    total = math.prod(pred.shape) if pred.shape else 1

    block_bytes, min_steps, approx_auto = _chip_config()
    if approx_reciprocal is None:
        approx_reciprocal = approx_auto

    pred_flat = pred.reshape(-1)
    label_flat = label.reshape(-1)

    lanes = next((c for c in _LANE_CANDIDATES if total % c == 0), None)
    tail_sum = jnp.float32(0.0)
    main = total
    if lanes is None:
        lanes = 128
        main = (total // lanes) * lanes
        tail_sum = jnp.sum(_focal_math(pred_flat[main:].astype(jnp.float32),
                                       label_flat[main:].astype(jnp.float32),
                                       gamma, alpha, lambda v: 1.0 / v))
        if main == 0:
            return tail_sum
        pred_flat = pred_flat[:main]
        label_flat = label_flat[:main]

    rows = main // lanes
    itemsizes = (jnp.dtype(pred.dtype).itemsize, jnp.dtype(label.dtype).itemsize)
    tile_rows, vmem_limit = _tile_plan(rows, lanes, itemsizes, block_bytes, min_steps)

    grid = (pl.cdiv(rows, tile_rows),)
    spec = pl.BlockSpec((tile_rows, lanes), lambda i: (i, 0))
    n = rows * lanes
    cost = pl.CostEstimate(
        flops=17 * n,
        transcendentals=4 * n,
        bytes_accessed=n * sum(itemsizes),
    )

    out = pl.pallas_call(
        _make_sum_kernel(gamma, alpha, approx_reciprocal),
        out_shape=jax.ShapeDtypeStruct((1, 1), jnp.float32),
        grid_spec=pltpu.PrefetchScalarGridSpec(
            num_scalar_prefetch=0,
            grid=grid,
            in_specs=[spec, spec],
            out_specs=pl.BlockSpec((1, 1), lambda i: (0, 0)),
            scratch_shapes=[pltpu.VMEM((1, 1), jnp.float32)],
        ),
        compiler_params=pltpu.CompilerParams(
            dimension_semantics=("arbitrary",),  # accumulator carried across steps
            vmem_limit_bytes=vmem_limit,
        ),
        cost_estimate=cost,
    )(pred_flat.reshape(rows, lanes), label_flat.reshape(rows, lanes))

    return out[0, 0] + tail_sum


def _reference(pred, label, gamma=GAMMA, alpha=ALPHA):
    x = pred.astype(jnp.float32)
    y = label.astype(jnp.float32)
    bce = jnp.maximum(x, 0.0) - x * y + jnp.log1p(jnp.exp(-jnp.abs(x)))
    p = jax.nn.sigmoid(x)
    p_t = y * p + (1 - y) * (1 - p)
    loss = bce * (1.0 - p_t) ** gamma
    if alpha > 0:
        loss = loss * (y * alpha + (1 - y) * (1 - alpha))
    return loss


if __name__ == "__main__":
    key = jax.random.PRNGKey(0)
    k1, k2 = jax.random.split(key)
    # Typical YOLO classification-branch shape: (batch, channels, H, W)
    shape = (2, 4, 16, 16)
    pred = jax.random.normal(k1, shape, dtype=jnp.float32)
    label = (jax.random.uniform(k2, shape) > 0.7).astype(jnp.float32)

    ref = _reference(pred, label)

    # Exact-reciprocal path: tight tolerance.
    out = jax.block_until_ready(focal_loss_yolo(pred, label, approx_reciprocal=False))
    assert out.shape == shape and out.dtype == pred.dtype
    assert jnp.allclose(out, ref, atol=1e-5, rtol=1e-5)

    # Chip-default path (approx vrcp auto-enabled on v7x): looser tolerance.
    out_auto = jax.block_until_ready(focal_loss_yolo(pred, label))
    assert jnp.allclose(out_auto, ref, atol=2e-3, rtol=2e-3)

    # Non-default gamma/alpha are honored (previous version silently ignored them).
    ref2 = _reference(pred, label, gamma=2.0, alpha=0.5)
    out2 = jax.block_until_ready(
        focal_loss_yolo(pred, label, gamma=2.0, alpha=0.5, approx_reciprocal=False))
    assert jnp.allclose(out2, ref2, atol=1e-5, rtol=1e-5)

    # bf16 I/O exercises the packed-sublane (16,128) tiling path.
    pred_bf = pred.astype(jnp.bfloat16)
    label_bf = label.astype(jnp.bfloat16)
    out_bf = jax.block_until_ready(
        focal_loss_yolo(pred_bf, label_bf, approx_reciprocal=False))
    assert out_bf.dtype == jnp.bfloat16
    assert jnp.allclose(out_bf.astype(jnp.float32), _reference(pred_bf, label_bf),
                        atol=2e-2, rtol=2e-2)

    # Fused-reduction variant (deletes the output HBM stream).
    loss_sum = jax.block_until_ready(focal_loss_yolo_sum(pred, label))
    assert jnp.allclose(loss_sum, jnp.sum(ref), rtol=5e-3, atol=1e-2)

    print("KERNEL_OK")
</pallas_src>

<mosaic_0001>
module attributes {stable_mosaic.version = 11 : i64} {
  func.func @kernel(%arg0: i32, %arg1: memref<4x512xf32, #tpu.memory_space<vmem>>, %arg2: memref<4x512xf32, #tpu.memory_space<vmem>>, %arg3: memref<4x512xf32, #tpu.memory_space<vmem>>) attributes {dimension_semantics = [#tpu.dimension_semantics<parallel>], iteration_bounds = array<i64: 1>, scalar_prefetch = 0 : i64, scratch_operands = 0 : i64, tpu.core_type = #tpu.core_type<tc>, window_params = [{transform_indices = @transform_0, window_bounds = array<i64: 4, 512>}, {transform_indices = @transform_1, window_bounds = array<i64: 4, 512>}, {transform_indices = @transform_2, window_bounds = array<i64: 4, 512>}]} {
    %c0 = arith.constant 0 : index
    %c0_0 = arith.constant 0 : index
    %0 = vector.load %arg1[%c0, %c0_0] : memref<4x512xf32, #tpu.memory_space<vmem>>, vector<4x512xf32>
    %c0_1 = arith.constant 0 : index
    %c0_2 = arith.constant 0 : index
    %1 = vector.load %arg2[%c0_1, %c0_2] : memref<4x512xf32, #tpu.memory_space<vmem>>, vector<4x512xf32>
    %2 = math.absf %0 : vector<4x512xf32>
    %cst = arith.constant 0.000000e+00 : f32
    %3 = vector.broadcast %cst : f32 to vector<4x512xf32>
    %4 = arith.subf %3, %2 : vector<4x512xf32>
    %5 = math.exp %4 : vector<4x512xf32>
    %cst_3 = arith.constant 0.000000e+00 : f32
    %6 = vector.broadcast %cst_3 : f32 to vector<4x512xf32>
    %7 = arith.maximumf %0, %6 : vector<4x512xf32>
    %8 = arith.mulf %0, %1 : vector<4x512xf32>
    %9 = arith.subf %7, %8 : vector<4x512xf32>
    %10 = math.log1p %5 : vector<4x512xf32>
    %11 = arith.addf %9, %10 : vector<4x512xf32>
    %cst_4 = arith.constant 1.000000e+00 : f32
    %12 = vector.broadcast %cst_4 : f32 to vector<4x512xf32>
    %13 = arith.addf %12, %5 : vector<4x512xf32>
    %cst_5 = arith.constant 1.000000e+00 : f32
    %14 = vector.broadcast %cst_5 : f32 to vector<4x512xf32>
    %15 = arith.divf %14, %13 : vector<4x512xf32>
    %cst_6 = arith.constant 0.000000e+00 : f32
    %16 = vector.broadcast %cst_6 : f32 to vector<4x512xf32>
    %17 = arith.cmpf oge, %0, %16 : vector<4x512xf32>
    %18 = arith.mulf %5, %15 : vector<4x512xf32>
    %19 = arith.select %17, %15, %18 : vector<4x512xi1>, vector<4x512xf32>
    %20 = arith.mulf %1, %19 : vector<4x512xf32>
    %cst_7 = arith.constant 1.000000e+00 : f32
    %21 = vector.broadcast %cst_7 : f32 to vector<4x512xf32>
    %22 = arith.subf %21, %1 : vector<4x512xf32>
    %cst_8 = arith.constant 1.000000e+00 : f32
    %23 = vector.broadcast %cst_8 : f32 to vector<4x512xf32>
    %24 = arith.subf %23, %19 : vector<4x512xf32>
    %25 = arith.mulf %22, %24 : vector<4x512xf32>
    %26 = arith.addf %20, %25 : vector<4x512xf32>
    %cst_9 = arith.constant 1.000000e+00 : f32
    %27 = vector.broadcast %cst_9 : f32 to vector<4x512xf32>
    %28 = arith.subf %27, %26 : vector<4x512xf32>
    %29 = math.sqrt %28 : vector<4x512xf32>
    %30 = arith.mulf %28, %29 : vector<4x512xf32>
    %31 = arith.mulf %11, %30 : vector<4x512xf32>
    %cst_10 = arith.constant 2.500000e-01 : f32
    %32 = vector.broadcast %cst_10 : f32 to vector<4x512xf32>
    %33 = arith.mulf %1, %32 : vector<4x512xf32>
    %cst_11 = arith.constant 1.000000e+00 : f32
    %34 = vector.broadcast %cst_11 : f32 to vector<4x512xf32>
    %35 = arith.subf %34, %1 : vector<4x512xf32>
    %cst_12 = arith.constant 7.500000e-01 : f32
    %36 = vector.broadcast %cst_12 : f32 to vector<4x512xf32>
    %37 = arith.mulf %35, %36 : vector<4x512xf32>
    %38 = arith.addf %33, %37 : vector<4x512xf32>
    %39 = arith.mulf %31, %38 : vector<4x512xf32>
    %c0_13 = arith.constant 0 : index
    %c0_14 = arith.constant 0 : index
    %40 = vector.load %arg3[%c0_13, %c0_14] : memref<4x512xf32, #tpu.memory_space<vmem>>, vector<4x512xf32>
    tpu.vector_store %arg3[%c0_13, %c0_14], %39 {strides = array<i32>} : memref<4x512xf32, #tpu.memory_space<vmem>>, vector<4x512xf32>,
    return
  }
  func.func @transform_0(%arg0: i32) -> (i32, i32) {
    %c0_i32 = arith.constant 0 : i32
    %c0_i32_0 = arith.constant 0 : i32
    return %arg0, %c0_i32 : i32, i32
  }
  func.func @transform_1(%arg0: i32) -> (i32, i32) {
    %c0_i32 = arith.constant 0 : i32
    %c0_i32_0 = arith.constant 0 : i32
    return %arg0, %c0_i32 : i32, i32
  }
  func.func @transform_2(%arg0: i32) -> (i32, i32) {
    %c0_i32 = arith.constant 0 : i32
    %c0_i32_0 = arith.constant 0 : i32
    return %arg0, %c0_i32 : i32, i32
  }
}

</mosaic_0001>

<bundles_post_ra>
// kernel: tpu_custom_call.1
= control target key start
LH: loop header
LB: loop body
LE: loop exit
PB: predicated region body
PF: predicated region fallthrough
CT: control target
= control target key end

     0   :  { %7 = vsyncpa [#allocation3], 0  ;;  %s305_s0 = inlined_call_operand.hbm [shape: f32[4,512], index: 0, kind: input, shape index: {}]   ;;  %s306_s1 = inlined_call_operand.hbm [shape: f32[4,512], index: 1, kind: input, shape index: {}]   ;;  %s307_s2 = inlined_call_operand.hbm [shape: f32[4,512], index: 2, kind: output, shape index: {}]  }
   0x1   :  { %8 = vsyncpa [#allocation6], 0 }
   0x2   :  { %9 = vsyncpa [#allocation4], 0  ;;  %s233_s9 = smov [#allocation2]   ;;  %s234_s11 = smov [#allocation5]  }
   0x3   :  { %s16_s10 = sshll.u32 %s233_s9, 4  ;;  %s26_s12 = sshll.u32 %s234_s11, 4  ;;  %s17_s10 = int_to_ptr.vmem [resolvable:$true] %s16_s10  ;;  %s27_s12 = int_to_ptr.vmem [resolvable:$true] %s26_s12 }
   0x4   :  { %s161_s15 = scalar_lea.hbm %s305_s0, 256 }
   0x5   :  { %p162_p0 = scmp.ne.s32.totalorder %s305_s0, %s161_s15  ;;  %p165_p1 = scmp.lt.u32.totalorder %s161_s15, %s305_s0 }
   0x7   :  { %p167_p2 = pnand %p165_p1, %p162_p0 }
   0x9   :  { %170 = shalt.err (!%p167_p2)
}
   0xa   :  { %s171_s20 = scalar_lea.vmem %s17_s10, 256  ;;  %p176_p4 = scmp.lt.s32.totalorder %s17_s10, %s17_s10 }
   0xb   :  { %p172_p3 = scmp.ne.s32.totalorder %s17_s10, %s171_s20  ;;  %p177_p5 = scmp.lt.s32.totalorder %s171_s20, %s171_s20 }
   0xd   :  { %p178_p6 = por %p177_p5, %p176_p4 }
   0xf   :  { %p179_p7 = pnand %p178_p6, %p172_p3 }
  0x11   :  { %182 = shalt.err (!%p179_p7)
}
  0x12   :  { %19 = dma.hbm_to_vmem [thread:$0]  %s305_s0, 256, %s17_s10, [#allocation3]  }
  0x13   :  { %s183_s25 = scalar_lea.hbm %s306_s1, 256 }
  0x14   :  { %p184_p8 = scmp.ne.s32.totalorder %s306_s1, %s183_s25  ;;  %p187_p9 = scmp.lt.u32.totalorder %s183_s25, %s306_s1 }
  0x16   :  { %p189_p10 = pnand %p187_p9, %p184_p8 }
  0x18   :  { %192 = shalt.err (!%p189_p10)
}
  0x19   :  { %s193_s30 = scalar_lea.vmem %s27_s12, 256  ;;  %p198_p12 = scmp.lt.s32.totalorder %s27_s12, %s27_s12 }
  0x1a   :  { %p194_p11 = scmp.ne.s32.totalorder %s27_s12, %s193_s30  ;;  %p199_p13 = scmp.lt.s32.totalorder %s193_s30, %s193_s30 }
  0x1c   :  { %p200_p0 = por %p199_p13, %p198_p12 }
  0x1e   :  { %p201_p1 = pnand %p200_p0, %p194_p11 }
  0x20   :  { %204 = shalt.err (!%p201_p1)
}
  0x21   :  { %29 = dma.hbm_to_vmem [thread:$0]  %s306_s1, 256, %s27_s12, [#allocation6]  }
  0x22   :  { %227 = dma.done.wait [#allocation3], 256  }
  0x23   :  { %228 = vsyncadd [#allocation3], 4294967040 }
  0x24   :  { %229 = dma.done.wait [#allocation6], 256  }
  0x25   :  { %230 = vsyncadd [#allocation6], 4294967040  ;;  %v36_v0 = vld [vmem:[#allocation2] sm:$0xff]  ;;  %v275_v1 = vld [vmem:[#allocation2 + $0x8] sm:$0xff]  ;;  %s235_s1 = smov [#allocation7]  }
  0x26   :  { %v40_v2 = vand.u32 2147483647, %v36_v0  ;;  %v41_v3 = vand.u32 2147483647, %v275_v1  ;;  %v38_v12 = vld [vmem:[#allocation5] sm:$0xff]  ;;  %vm80_vm0 = vcmp.ge.f32.partialorder %v36_v0, 0.0 }
  0x27   :  { %v39_v15 = vld [vmem:[#allocation5 + $0x8] sm:$0xff]  ;;  %v88_v17 = vsub.f32 1.0, %v38_v12  ;;  %vm81_vm1 = vcmp.ge.f32.partialorder %v275_v1, 0.0  ;;  %v48_v37 = vmax.f32 %v36_v0, 0.0  ;;  %v50_v38 = vmul.f32 %v38_v12, %v36_v0  ;;  %s132_s4 = sshll.u32 %s235_s1, 4  ;;  %s133_s4 = int_to_ptr.vmem [resolvable:$true] %s132_s4 }
  0x28   :  { %v42_v4 = vsub.f32 0.0, %v40_v2  ;;  %v43_v5 = vsub.f32 0.0, %v41_v3  ;;  %v89_v22 = vsub.f32 1.0, %v39_v15  ;;  %v49_v46 = vmax.f32 %v275_v1, 0.0  ;;  %s205_s5 = scalar_lea.vmem %s133_s4, 256  ;;  %p210_p3 = scmp.lt.s32.totalorder %s133_s4, %s133_s4 }
  0x29   :  { %v52_v45 = vsub.f32 %v48_v37, %v50_v38  ;;  %v51_v47 = vmul.f32 %v39_v15, %v275_v1  ;;  %v116_v55 = vmul.f32 0.25, %v38_v12  ;;  %v118_v56 = vmul.f32 0.75, %v88_v17  ;;  %p206_p2 = scmp.ne.s32.totalorder %s133_s4, %s205_s5  ;;  %p211_p4 = scmp.lt.s32.totalorder %s205_s5, %s205_s5 }
  0x2a   :  { %v44_v6 = vmul.f32 1.442695, %v42_v4  ;;  %v46_v7 = vmul.f32 1.442695, %v43_v5  ;;  %v117_v59 = vmul.f32 0.25, %v39_v15  ;;  %v119_v2 = vmul.f32 0.75, %v89_v22 }
  0x2b   :  { %v53_v58 = vsub.f32 %v49_v46, %v51_v47  ;;  %v120_v4 = vadd.f32 %v118_v56, %v116_v55  ;;  %p212_p5 = por %p211_p4, %p210_p3 }
  0x2c   :  { %145 = vpow2.f32 %v44_v6 }
  0x2d   :  { %147 = vpow2.f32 %v46_v7  ;;  %p213_p6 = pnand %p212_p5, %p206_p2 }
  0x36   :  { %v146_v8 = vpop.eup %145 }
  0x37   :  { %v148_v9 = vpop.eup %147  ;;  %v54_v10 = vadd.f32 1.0, %v146_v8  ;;  %v57_v29 = vmul.f32 -0.5, %v146_v8  ;;  %v60_v36 = vand.u32 2147483647, %v146_v8 }
  0x38   :  { %v63_v11 = vadd.f32 1.0, %v148_v9  ;;  %v66_v33 = vmul.f32 -0.5, %v148_v9  ;;  %v69_v44 = vand.u32 2147483647, %v148_v9 }
  0x39   :  { %149 = vrcp.f32 %v54_v10  ;;  %v58_v32 = vadd.f32 1.0, %v57_v29  ;;  %vm279_vm2 = vcmp.lt.f32.partialorder %v60_v36, 0.0004427343 }
  0x3a   :  { %151 = vrcp.f32 %v63_v11  ;;  %v67_v41 = vadd.f32 1.0, %v66_v33  ;;  %vm287_vm4 = vcmp.lt.f32.partialorder %v69_v44, 0.0004427343 }
  0x3b   :  { %153 = vlog2.f32 %v54_v10  ;;  %v59_v40 = vmul.f32 %v146_v8, %v58_v32  ;;  %v121_v10 = vadd.f32 %v119_v2, %v117_v59 }
  0x3c   :  { %155 = vlog2.f32 %v63_v11  ;;  %v68_v50 = vmul.f32 %v148_v9, %v67_v41 }
  0x43   :  { %v150_v13 = vpop.eup %149 }
  0x44   :  { %v82_v14 = vmul.f32 %v150_v13, %v146_v8  ;;  %v152_v16 = vpop.eup %151 }
  0x45   :  { %v83_v19 = vmul.f32 %v152_v16, %v148_v9  ;;  %v154_v35 = vpop.eup %153 }
  0x46   :  { %v84_v18 = vsel %vm80_vm0, %v150_v13, %v82_v14  ;;  %v56_v39 = vmul.f32 0.6931472, %v154_v35  ;;  %v156_v42 = vpop.eup %155 }
  0x47   :  { %v86_v20 = vmul.f32 %v84_v18, %v38_v12  ;;  %v90_v21 = vsub.f32 1.0, %v84_v18  ;;  %v85_v23 = vsel %vm81_vm1, %v152_v16, %v83_v19  ;;  %v65_v49 = vmul.f32 0.6931472, %v156_v42 }
  0x48   :  { %v87_v25 = vmul.f32 %v85_v23, %v39_v15  ;;  %v91_v26 = vsub.f32 1.0, %v85_v23  ;;  %v62_v48 = vsel %vm279_vm2, %v59_v40, %v56_v39 }
  0x49   :  { %v92_v24 = vmul.f32 %v90_v21, %v88_v17  ;;  %v72_v57 = vadd.f32 %v62_v48, %v52_v45  ;;  %v71_v62 = vsel %vm287_vm4, %v68_v50, %v65_v49 }
  0x4a   :  { %v93_v28 = vmul.f32 %v91_v26, %v89_v22  ;;  %v73_v5 = vadd.f32 %v71_v62, %v53_v58 }
  0x4b   :  { %v94_v27 = vadd.f32 %v92_v24, %v86_v20 }
  0x4c   :  { %v95_v31 = vadd.f32 %v93_v28, %v87_v25 }
  0x4d   :  { %v96_v30 = vsub.f32 1.0, %v94_v27 }
  0x4e   :  { %v97_v34 = vsub.f32 1.0, %v95_v31 }
  0x4f   :  { %157 = vrsqrt.f32 %v96_v30  ;;  %vm100_vm3 = vcmp.eq.f32.partialorder %v96_v30, inf  ;;  %v103_v52 = vand.u32 2147483648, %v96_v30  ;;  %vm102_vm5 = vcmp.eq.f32.partialorder %v96_v30, 0.0 }
  0x50   :  { %159 = vrsqrt.f32 %v97_v34  ;;  %vm107_vm6 = vcmp.eq.f32.partialorder %v97_v34, inf  ;;  %v110_v63 = vand.u32 2147483648, %v97_v34  ;;  %vm109_vm7 = vcmp.eq.f32.partialorder %v97_v34, 0.0 }
  0x59   :  { %v158_v51 = vpop.eup %157 }
  0x5a   :  { %v99_v54 = vmul.f32 %v158_v51, %v96_v30  ;;  %v160_v60 = vpop.eup %159 }
  0x5b   :  { %v106_v1 = vmul.f32 %v160_v60, %v97_v34 }
  0x5c   :  { %v101_v61 = vsel %vm100_vm3, %v96_v30, %v99_v54 }
  0x5d   :  { %v104_v0 = vsel %vm102_vm5, %v103_v52, %v101_v61  ;;  %v108_v6 = vsel %vm107_vm6, %v97_v34, %v106_v1 }
  0x5e   :  { %v112_v3 = vmul.f32 %v104_v0, %v96_v30  ;;  %v111_v8 = vsel %vm109_vm7, %v110_v63, %v108_v6 }
  0x5f   :  { %v113_v9 = vmul.f32 %v111_v8, %v97_v34 }
  0x60   :  { %v114_v7 = vmul.f32 %v112_v3, %v72_v57 }
  0x61   :  { %v115_v12 = vmul.f32 %v113_v9, %v73_v5 }
  0x62   :  { %v122_v11 = vmul.f32 %v120_v4, %v114_v7 }
  0x63   :  { %v123_v13 = vmul.f32 %v121_v10, %v115_v12 }
  0x64   :  { %124 = vst [vmem:[#allocation7] sm:$0xff] %v122_v11 }
  0x65   :  { %125 = vst [vmem:[#allocation7 + $0x8] sm:$0xff] %v123_v13 }
  0x66   :  { %216 = shalt.err (!%p213_p6)
}
  0x67   :  { %s217_s8 = scalar_lea.hbm %s307_s2, 256 }
  0x68   :  { %p218_p7 = scmp.ne.s32.totalorder %s307_s2, %s217_s8  ;;  %p221_p8 = scmp.lt.u32.totalorder %s217_s8, %s307_s2 }
  0x6a   :  { %p223_p9 = pnand %p221_p8, %p218_p7 }
  0x6c   :  { %226 = shalt.err (!%p223_p9)
}
  0x6d   :  { %135 = dma.vmem_to_hbm [thread:$0]  %s133_s4, 256, %s307_s2, [#allocation4]  }
  0x6e   :  { %231 = dma.done.wait [#allocation4], 256  }
  0x6f   :  { %232 = vsyncadd [#allocation4], 4294967040 }
  0x70   :  { %139 = vsyncpa [#allocation3], 1 }
  0x71   :  { %140 = vsyncpa [#allocation6], 1 }
  0x72   :  { %141 = vsyncpa [#allocation4], 1 }

</bundles_post_ra>
